<compile_context>
chip_gen: v7x
topology: tpu7x:2x2x1
jax: 0.10.0
libtpu: 0.0.40
codegen_flags: <defaults>
</compile_context>

<pallas_src>
import functools

import jax
import jax.numpy as jnp
from jax.experimental import pallas as pl
from jax.experimental.pallas import tpu as pltpu


def _round_up(a: int, b: int) -> int:
    return ((a + b - 1) // b) * b


def _triplet_wrt_kernel(x_ref, tcol_ref, trow_ref, cmask_ref,
                        loss_ref, corr_ref,
                        *, tm: int, normalize_feature: bool,
                        bf16_gram: bool, has_padding: bool):
    i = pl.program_id(0)
    row0 = pl.multiple_of(i * tm, tm)

    x_all = x_ref[...].astype(jnp.float32)                       # (Np, D)
    x_row = x_ref[pl.ds(row0, tm), :].astype(jnp.float32)        # (TM, D)

    if normalize_feature:
        # normalize(x, axis=-1): x / (||x||_2 + 1e-12)
        inv_all = 1.0 / (jnp.sqrt(jnp.sum(x_all * x_all, axis=-1, keepdims=True)) + 1e-12)
        x_all = x_all * inv_all
        inv_row = 1.0 / (jnp.sqrt(jnp.sum(x_row * x_row, axis=-1, keepdims=True)) + 1e-12)
        x_row = x_row * inv_row

    # pdist_torch: dist[i,j] = sqrt(clamp(|xi|^2 + |xj|^2 - 2 xi.xj, 1e-12))
    sq_row = jnp.sum(x_row * x_row, axis=1, keepdims=True)                    # (TM, 1)
    sq_col = jnp.transpose(jnp.sum(x_all * x_all, axis=1, keepdims=True))     # (1, Np)

    if bf16_gram:
        lhs = x_row.astype(jnp.bfloat16)
        rhs = x_all.astype(jnp.bfloat16)
    else:
        lhs, rhs = x_row, x_all
    gram = jax.lax.dot_general(                                               # MXU, f32 acc
        lhs, rhs, (((1,), (1,)), ((), ())),
        preferred_element_type=jnp.float32)                                   # (TM, Np)

    dist = jnp.sqrt(jnp.maximum(sq_row + sq_col - 2.0 * gram, 1e-12))         # (TM, Np)

    tcol = tcol_ref[pl.ds(row0, tm), :]                                       # (TM, 1) i32
    trow = trow_ref[...]                                                      # (1, Np) i32
    same = (tcol == trow).astype(jnp.float32)                                 # (TM, Np)

    if has_padding:
        cvalid = cmask_ref[...]                                               # (1, Np)
        is_pos = same * cvalid
        is_neg = (1.0 - same) * cvalid
    else:
        is_pos = same
        is_neg = 1.0 - same

    # --- positive branch: softmax_weights(dist*is_pos, is_pos), weighted sum ---
    max_p = jnp.max(dist * is_pos, axis=1, keepdims=True)                     # (TM, 1)
    e_p = jnp.exp(dist - max_p) * is_pos          # exp once; == exp(dist*mask - max)*mask
    z_p = jnp.sum(e_p, axis=1, keepdims=True) + 1e-6
    furthest_positive = jnp.sum(dist * e_p, axis=1, keepdims=True) / z_p      # (TM, 1)

    # --- negative branch: softmax_weights(-dist*is_neg, is_neg), weighted sum ---
    max_n = jnp.max(-(dist * is_neg), axis=1, keepdims=True)                  # (TM, 1)
    e_n = jnp.exp(-dist - max_n) * is_neg
    z_n = jnp.sum(e_n, axis=1, keepdims=True) + 1e-6
    closest_negative = jnp.sum(dist * e_n, axis=1, keepdims=True) / z_n       # (TM, 1)

    margin = closest_negative - furthest_positive
    # SoftMarginLoss with y=+1, per row, numerically stable softplus(-margin)
    loss_ref[...] = jnp.maximum(-margin, 0.0) + jnp.log1p(jnp.exp(-jnp.abs(margin)))
    corr_ref[...] = (closest_negative >= furthest_positive).astype(jnp.float32)


def triplet_loss_wrt(inputs, targets, normalize_feature: bool = False,
                     *, bf16_gram: bool = True, block_rows: int = 128):
    """Returns (loss: f32 scalar, correct: int32 scalar), matching the torch forward."""
    x = jnp.asarray(inputs, jnp.float32)
    n, d = x.shape
    t = jnp.asarray(targets, jnp.int32).reshape(n)

    tm = min(block_rows, _round_up(n, 8))        # row-tile (multiple of 8 sublanes)
    n_pad = _round_up(n, tm)
    has_padding = n_pad != n

    if has_padding:
        x = jnp.pad(x, ((0, n_pad - n), (0, 0)))
        t = jnp.pad(t, (0, n_pad - n), constant_values=-1)
    tcol = t.reshape(n_pad, 1)
    trow = t.reshape(1, n_pad)
    cmask = (jnp.arange(n_pad) < n).astype(jnp.float32).reshape(1, n_pad)

    kernel = functools.partial(
        _triplet_wrt_kernel, tm=tm, normalize_feature=normalize_feature,
        bf16_gram=bf16_gram, has_padding=has_padding)

    vmem = pltpu.MemorySpace.VMEM
    loss_rows, corr_rows = pl.pallas_call(
        kernel,
        grid=(n_pad // tm,),
        in_specs=[
            pl.BlockSpec(memory_space=vmem),                 # x, resident (Np, D)
            pl.BlockSpec(memory_space=vmem),                 # targets column (Np, 1)
            pl.BlockSpec(memory_space=vmem),                 # targets row    (1, Np)
            pl.BlockSpec(memory_space=vmem),                 # column validity (1, Np)
        ],
        out_specs=(pl.BlockSpec((tm, 1), lambda i: (i, 0)),
                   pl.BlockSpec((tm, 1), lambda i: (i, 0))),
        out_shape=(jax.ShapeDtypeStruct((n_pad, 1), jnp.float32),
                   jax.ShapeDtypeStruct((n_pad, 1), jnp.float32)),
        compiler_params=pltpu.CompilerParams(
            dimension_semantics=("parallel",),               # row tiles are independent
            vmem_limit_bytes=64 * 1024 * 1024),
    )(x, tcol, trow, cmask)

    loss = jnp.mean(loss_rows[:n, 0])
    correct = jnp.sum(corr_rows[:n, 0]).astype(jnp.int32)
    return loss, correct


def _reference(inputs, targets, normalize_feature=False, bf16_gram=False):
    """Pure-JAX reference reproducing the torch semantics."""
    x = jnp.asarray(inputs, jnp.float32)
    if normalize_feature:
        x = x / (jnp.linalg.norm(x, axis=-1, keepdims=True) + 1e-12)
    sq = jnp.sum(x * x, axis=1, keepdims=True)
    if bf16_gram:
        gram = jnp.dot(x.astype(jnp.bfloat16), x.astype(jnp.bfloat16).T,
                       preferred_element_type=jnp.float32)
    else:
        gram = x @ x.T
    dist = jnp.sqrt(jnp.maximum(sq + sq.T - 2.0 * gram, 1e-12))
    t = jnp.asarray(targets, jnp.int32)
    is_pos = (t[:, None] == t[None, :]).astype(jnp.float32)
    is_neg = 1.0 - is_pos
    dist_ap = dist * is_pos
    dist_an = dist * is_neg

    def sw(dd, m):
        mx = jnp.max(dd * m, axis=1, keepdims=True)
        diff = dd - mx
        z = jnp.sum(jnp.exp(diff) * m, axis=1, keepdims=True) + 1e-6
        return jnp.exp(diff) * m / z

    fp = jnp.sum(dist_ap * sw(dist_ap, is_pos), axis=1)
    cn = jnp.sum(dist_an * sw(-dist_an, is_neg), axis=1)
    margin = cn - fp
    loss = jnp.mean(jnp.maximum(-margin, 0.0) + jnp.log1p(jnp.exp(-jnp.abs(margin))))
    correct = jnp.sum(cn >= fp).astype(jnp.int32)
    return loss, correct


if __name__ == "__main__":
    key = jax.random.PRNGKey(0)
    N, D = 8, 32  # 8 samples, 32-dim embeddings; 2 samples per identity
    inputs = jax.random.normal(key, (N, D), dtype=jnp.float32)
    targets = jnp.array([0, 0, 1, 1, 2, 2, 3, 3], dtype=jnp.int32)

    for nf in (False, True):
        loss, correct = triplet_loss_wrt(inputs, targets, normalize_feature=nf)
        jax.block_until_ready((loss, correct))

        # Tight check against a reference that mirrors the kernel's bf16 gram matmul.
        ref_loss_bf16, ref_corr_bf16 = _reference(inputs, targets, nf, bf16_gram=True)
        assert jnp.allclose(loss, ref_loss_bf16, atol=1e-3, rtol=1e-3), \
            (nf, float(loss), float(ref_loss_bf16))
        assert int(correct) == int(ref_corr_bf16), (nf, int(correct), int(ref_corr_bf16))

        # Loose sanity check against the full-f32 reference (bf16 gram is a deliberate
        # MXU-throughput tradeoff).
        ref_loss_f32, _ = _reference(inputs, targets, nf, bf16_gram=False)
        assert jnp.allclose(loss, ref_loss_f32, atol=0.1, rtol=0.1), \
            (nf, float(loss), float(ref_loss_f32))

    print("KERNEL_OK")
</pallas_src>

<mosaic_0001>
module attributes {stable_mosaic.version = 11 : i64} {
  func.func @_triplet_wrt_kernel(%arg0: i32, %arg1: memref<8x32xf32, #tpu.memory_space<vmem>>, %arg2: memref<8x1xi32, #tpu.memory_space<vmem>>, %arg3: memref<1x8xi32, #tpu.memory_space<vmem>>, %arg4: memref<1x8xf32, #tpu.memory_space<vmem>>, %arg5: memref<8x1xf32, #tpu.memory_space<vmem>>, %arg6: memref<8x1xf32, #tpu.memory_space<vmem>>) attributes {dimension_semantics = [#tpu.dimension_semantics<parallel>], iteration_bounds = array<i64: 1>, scalar_prefetch = 0 : i64, scratch_operands = 0 : i64, tpu.core_type = #tpu.core_type<tc>, window_params = [{pipeline_mode = #tpu.pipeline_mode<synchronous>, transform_indices = @transform_0, window_bounds = array<i64: 8, 32>}, {pipeline_mode = #tpu.pipeline_mode<synchronous>, transform_indices = @transform_1, window_bounds = array<i64: 8, 1>}, {pipeline_mode = #tpu.pipeline_mode<synchronous>, transform_indices = @transform_2, window_bounds = array<i64: 1, 8>}, {pipeline_mode = #tpu.pipeline_mode<synchronous>, transform_indices = @transform_3, window_bounds = array<i64: 1, 8>}, {transform_indices = @transform_4, window_bounds = array<i64: 8, 1>}, {transform_indices = @transform_5, window_bounds = array<i64: 8, 1>}]} {
    %c8_i32 = arith.constant 8 : i32
    %0 = arith.muli %arg0, %c8_i32 : i32
    %1 = tpu.assume_multiple %0, 8 : i32
    %c0 = arith.constant 0 : index
    %c0_0 = arith.constant 0 : index
    %2 = vector.load %arg1[%c0, %c0_0] : memref<8x32xf32, #tpu.memory_space<vmem>>, vector<8x32xf32>
    %3 = arith.index_cast %1 : i32 to index
    %c0_1 = arith.constant 0 : index
    %4 = vector.load %arg1[%3, %c0_1] : memref<8x32xf32, #tpu.memory_space<vmem>>, vector<8x32xf32>
    %5 = arith.mulf %4, %4 : vector<8x32xf32>
    %cst = arith.constant dense<0.000000e+00> : vector<8xf32>
    %6 = vector.multi_reduction <add>, %5, %cst [1] : vector<8x32xf32> to vector<8xf32>
    %7 = vector.shape_cast %6 : vector<8xf32> to vector<8x1xf32>
    %8 = arith.mulf %2, %2 : vector<8x32xf32>
    %cst_2 = arith.constant dense<0.000000e+00> : vector<8xf32>
    %9 = vector.multi_reduction <add>, %8, %cst_2 [1] : vector<8x32xf32> to vector<8xf32>
    %10 = vector.shape_cast %9 : vector<8xf32> to vector<8x1xf32>
    %11 = tpu.transpose %10, [1, 0] : vector<8x1xf32> -> vector<1x8xf32>
    %12 = arith.truncf %4 : vector<8x32xf32> to vector<8x32xbf16>
    %13 = arith.truncf %2 : vector<8x32xf32> to vector<8x32xbf16>
    %cst_3 = arith.constant dense<0.000000e+00> : vector<8x8xf32>
    %14 = tpu.matmul %12, %13, %cst_3 {dimension_numbers = #tpu.dot_dimension_numbers<[1], [1], [0], [0], [0, 0, 1, 0], [], []>} : vector<8x32xbf16>, vector<8x32xbf16>, vector<8x8xf32> -> vector<8x8xf32>
    %15 = vector.broadcast %7 : vector<8x1xf32> to vector<8x8xf32>
    %16 = vector.broadcast %11 : vector<1x8xf32> to vector<8x8xf32>
    %17 = arith.addf %15, %16 : vector<8x8xf32>
    %cst_4 = arith.constant 2.000000e+00 : f32
    %18 = vector.broadcast %cst_4 : f32 to vector<8x8xf32>
    %19 = arith.mulf %18, %14 : vector<8x8xf32>
    %20 = arith.subf %17, %19 : vector<8x8xf32>
    %cst_5 = arith.constant 9.99999996E-13 : f32
    %21 = vector.broadcast %cst_5 : f32 to vector<8x8xf32>
    %22 = arith.maximumf %20, %21 : vector<8x8xf32>
    %23 = math.sqrt %22 : vector<8x8xf32>
    %24 = arith.index_cast %1 : i32 to index
    %c0_6 = arith.constant 0 : index
    %25 = vector.load %arg2[%24, %c0_6] : memref<8x1xi32, #tpu.memory_space<vmem>>, vector<8x1xi32>
    %c0_7 = arith.constant 0 : index
    %c0_8 = arith.constant 0 : index
    %26 = vector.load %arg3[%c0_7, %c0_8] : memref<1x8xi32, #tpu.memory_space<vmem>>, vector<1x8xi32>
    %27 = vector.broadcast %25 : vector<8x1xi32> to vector<8x8xi32>
    %28 = vector.broadcast %26 : vector<1x8xi32> to vector<8x8xi32>
    %29 = arith.cmpi eq, %27, %28 : vector<8x8xi32>
    %30 = arith.extui %29 : vector<8x8xi1> to vector<8x8xi32>
    %31 = arith.sitofp %30 : vector<8x8xi32> to vector<8x8xf32>
    %cst_9 = arith.constant 1.000000e+00 : f32
    %32 = vector.broadcast %cst_9 : f32 to vector<8x8xf32>
    %33 = arith.subf %32, %31 : vector<8x8xf32>
    %34 = arith.mulf %23, %31 : vector<8x8xf32>
    %cst_10 = arith.constant dense<0xFF800000> : vector<8xf32>
    %35 = vector.multi_reduction <maximumf>, %34, %cst_10 [1] : vector<8x8xf32> to vector<8xf32>
    %36 = vector.shape_cast %35 : vector<8xf32> to vector<8x1xf32>
    %37 = vector.broadcast %36 : vector<8x1xf32> to vector<8x8xf32>
    %38 = arith.subf %23, %37 : vector<8x8xf32>
    %39 = math.exp %38 : vector<8x8xf32>
    %40 = arith.mulf %39, %31 : vector<8x8xf32>
    %cst_11 = arith.constant dense<0.000000e+00> : vector<8xf32>
    %41 = vector.multi_reduction <add>, %40, %cst_11 [1] : vector<8x8xf32> to vector<8xf32>
    %42 = vector.shape_cast %41 : vector<8xf32> to vector<8x1xf32>
    %cst_12 = arith.constant 9.99999997E-7 : f32
    %43 = vector.broadcast %cst_12 : f32 to vector<8x1xf32>
    %44 = arith.addf %42, %43 : vector<8x1xf32>
    %45 = arith.mulf %23, %40 : vector<8x8xf32>
    %cst_13 = arith.constant dense<0.000000e+00> : vector<8xf32>
    %46 = vector.multi_reduction <add>, %45, %cst_13 [1] : vector<8x8xf32> to vector<8xf32>
    %47 = vector.shape_cast %46 : vector<8xf32> to vector<8x1xf32>
    %48 = arith.divf %47, %44 : vector<8x1xf32>
    %49 = arith.mulf %23, %33 : vector<8x8xf32>
    %cst_14 = arith.constant 0.000000e+00 : f32
    %50 = vector.broadcast %cst_14 : f32 to vector<8x8xf32>
    %51 = arith.subf %50, %49 : vector<8x8xf32>
    %cst_15 = arith.constant dense<0xFF800000> : vector<8xf32>
    %52 = vector.multi_reduction <maximumf>, %51, %cst_15 [1] : vector<8x8xf32> to vector<8xf32>
    %53 = vector.shape_cast %52 : vector<8xf32> to vector<8x1xf32>
    %cst_16 = arith.constant 0.000000e+00 : f32
    %54 = vector.broadcast %cst_16 : f32 to vector<8x8xf32>
    %55 = arith.subf %54, %23 : vector<8x8xf32>
    %56 = vector.broadcast %53 : vector<8x1xf32> to vector<8x8xf32>
    %57 = arith.subf %55, %56 : vector<8x8xf32>
    %58 = math.exp %57 : vector<8x8xf32>
    %59 = arith.mulf %58, %33 : vector<8x8xf32>
    %cst_17 = arith.constant dense<0.000000e+00> : vector<8xf32>
    %60 = vector.multi_reduction <add>, %59, %cst_17 [1] : vector<8x8xf32> to vector<8xf32>
    %61 = vector.shape_cast %60 : vector<8xf32> to vector<8x1xf32>
    %cst_18 = arith.constant 9.99999997E-7 : f32
    %62 = vector.broadcast %cst_18 : f32 to vector<8x1xf32>
    %63 = arith.addf %61, %62 : vector<8x1xf32>
    %64 = arith.mulf %23, %59 : vector<8x8xf32>
    %cst_19 = arith.constant dense<0.000000e+00> : vector<8xf32>
    %65 = vector.multi_reduction <add>, %64, %cst_19 [1] : vector<8x8xf32> to vector<8xf32>
    %66 = vector.shape_cast %65 : vector<8xf32> to vector<8x1xf32>
    %67 = arith.divf %66, %63 : vector<8x1xf32>
    %68 = arith.subf %67, %48 : vector<8x1xf32>
    %cst_20 = arith.constant 0.000000e+00 : f32
    %69 = vector.broadcast %cst_20 : f32 to vector<8x1xf32>
    %70 = arith.subf %69, %68 : vector<8x1xf32>
    %cst_21 = arith.constant 0.000000e+00 : f32
    %71 = vector.broadcast %cst_21 : f32 to vector<8x1xf32>
    %72 = arith.maximumf %70, %71 : vector<8x1xf32>
    %73 = math.absf %68 : vector<8x1xf32>
    %cst_22 = arith.constant 0.000000e+00 : f32
    %74 = vector.broadcast %cst_22 : f32 to vector<8x1xf32>
    %75 = arith.subf %74, %73 : vector<8x1xf32>
    %76 = math.exp %75 : vector<8x1xf32>
    %77 = math.log1p %76 : vector<8x1xf32>
    %78 = arith.addf %72, %77 : vector<8x1xf32>
    %c0_23 = arith.constant 0 : index
    %c0_24 = arith.constant 0 : index
    %79 = vector.load %arg5[%c0_23, %c0_24] : memref<8x1xf32, #tpu.memory_space<vmem>>, vector<8x1xf32>
    tpu.vector_store %arg5[%c0_23, %c0_24], %78 {strides = array<i32>} : memref<8x1xf32, #tpu.memory_space<vmem>>, vector<8x1xf32>,
    %80 = arith.cmpf oge, %67, %48 : vector<8x1xf32>
    %81 = arith.extui %80 : vector<8x1xi1> to vector<8x1xi32>
    %82 = arith.sitofp %81 : vector<8x1xi32> to vector<8x1xf32>
    %c0_25 = arith.constant 0 : index
    %c0_26 = arith.constant 0 : index
    %83 = vector.load %arg6[%c0_25, %c0_26] : memref<8x1xf32, #tpu.memory_space<vmem>>, vector<8x1xf32>
    tpu.vector_store %arg6[%c0_25, %c0_26], %82 {strides = array<i32>} : memref<8x1xf32, #tpu.memory_space<vmem>>, vector<8x1xf32>,
    return
  }
  func.func @transform_0(%arg0: i32) -> (i32, i32) {
    %c0_i32 = arith.constant 0 : i32
    %c0_i32_0 = arith.constant 0 : i32
    %c0_i32_1 = arith.constant 0 : i32
    return %c0_i32, %c0_i32_0 : i32, i32
  }
  func.func @transform_1(%arg0: i32) -> (i32, i32) {
    %c0_i32 = arith.constant 0 : i32
    %c0_i32_0 = arith.constant 0 : i32
    %c0_i32_1 = arith.constant 0 : i32
    return %c0_i32, %c0_i32_0 : i32, i32
  }
  func.func @transform_2(%arg0: i32) -> (i32, i32) {
    %c0_i32 = arith.constant 0 : i32
    %c0_i32_0 = arith.constant 0 : i32
    %c0_i32_1 = arith.constant 0 : i32
    return %c0_i32, %c0_i32_0 : i32, i32
  }
  func.func @transform_3(%arg0: i32) -> (i32, i32) {
    %c0_i32 = arith.constant 0 : i32
    %c0_i32_0 = arith.constant 0 : i32
    %c0_i32_1 = arith.constant 0 : i32
    return %c0_i32, %c0_i32_0 : i32, i32
  }
  func.func @transform_4(%arg0: i32) -> (i32, i32) {
    %c0_i32 = arith.constant 0 : i32
    %c0_i32_0 = arith.constant 0 : i32
    return %arg0, %c0_i32 : i32, i32
  }
  func.func @transform_5(%arg0: i32) -> (i32, i32) {
    %c0_i32 = arith.constant 0 : i32
    %c0_i32_0 = arith.constant 0 : i32
    return %arg0, %c0_i32 : i32, i32
  }
}

</mosaic_0001>

<bundles_post_ra>
// kernel: tpu_custom_call.1
= control target key start
LH: loop header
LB: loop body
LE: loop exit
PB: predicated region body
PF: predicated region fallthrough
CT: control target
= control target key end

     0   :  { %11 = vsyncpa [#allocation3], 0  ;;  %s586_s0 = inlined_call_operand.hbm [shape: f32[8,32], index: 0, kind: input, shape index: {}]   ;;  %s587_s1 = inlined_call_operand.hbm [shape: s32[8,1], index: 1, kind: input, shape index: {}]   ;;  %s588_s2 = inlined_call_operand.hbm [shape: s32[1,8], index: 2, kind: input, shape index: {}]   ;;  %s589_s3 = inlined_call_operand.hbm [shape: f32[1,8], index: 3, kind: input, shape index: {}]   ;;  %s590_s4 = inlined_call_operand.hbm [shape: f32[8,1], index: 4, kind: output, shape index: {0}]   ;;  %s591_s5 = inlined_call_operand.hbm [shape: f32[8,1], index: 5, kind: output, shape index: {1}]  }
   0x1   :  { %12 = vsyncpa [#allocation6], 0 }
   0x2   :  { %13 = vsyncpa [#allocation9], 0 }
   0x3   :  { %14 = vsyncpa [#allocation4], 0 }
   0x4   :  { %15 = vsyncpa [#allocation12], 0  ;;  %s463_s18 = smov [#allocation5]   ;;  %s464_s20 = smov [#allocation2]  }
   0x5   :  { %s32_s19 = sshll.u32 %s463_s18, 4  ;;  %s22_s21 = sshll.u32 %s464_s20, 4  ;;  %s33_s19 = int_to_ptr.vmem [resolvable:$true] %s32_s19  ;;  %s23_s21 = int_to_ptr.vmem [resolvable:$true] %s22_s21 }
   0x6   :  { %s321_s24 = scalar_lea.hbm %s587_s1, 128 }
   0x7   :  { %p322_p0 = scmp.ne.s32.totalorder %s587_s1, %s321_s24  ;;  %p325_p1 = scmp.lt.u32.totalorder %s321_s24, %s587_s1 }
   0x9   :  { %p327_p2 = pnand %p325_p1, %p322_p0 }
   0xb   :  { %330 = shalt.err (!%p327_p2)
}
   0xc   :  { %s331_s29 = scalar_lea.vmem %s33_s19, 128  ;;  %p336_p4 = scmp.lt.s32.totalorder %s33_s19, %s33_s19 }
   0xd   :  { %p332_p3 = scmp.ne.s32.totalorder %s33_s19, %s331_s29  ;;  %p337_p5 = scmp.lt.s32.totalorder %s331_s29, %s331_s29 }
   0xf   :  { %p338_p6 = por %p337_p5, %p336_p4 }
  0x11   :  { %p339_p7 = pnand %p338_p6, %p332_p3 }
  0x13   :  { %342 = shalt.err (!%p339_p7)
}
  0x14   :  { %35 = dma.hbm_to_vmem [thread:$0]  %s587_s1, 128, %s33_s19, [#allocation6]  }
  0x15   :  { %s343_s9 = scalar_lea.hbm %s586_s0, 128 }
  0x16   :  { %p344_p8 = scmp.ne.s32.totalorder %s586_s0, %s343_s9  ;;  %p347_p9 = scmp.lt.u32.totalorder %s343_s9, %s586_s0 }
  0x18   :  { %p349_p10 = pnand %p347_p9, %p344_p8 }
  0x1a   :  { %352 = shalt.err (!%p349_p10)
}
  0x1b   :  { %s353_s14 = scalar_lea.vmem %s23_s21, 128  ;;  %p358_p12 = scmp.lt.s32.totalorder %s23_s21, %s23_s21 }
  0x1c   :  { %p354_p11 = scmp.ne.s32.totalorder %s23_s21, %s353_s14  ;;  %p359_p13 = scmp.lt.s32.totalorder %s353_s14, %s353_s14 }
  0x1e   :  { %p360_p0 = por %p359_p13, %p358_p12 }
  0x20   :  { %p361_p1 = pnand %p360_p0, %p354_p11 }
  0x22   :  { %364 = shalt.err (!%p361_p1)
}
  0x23   :  { %25 = dma.hbm_to_vmem [thread:$0]  %s586_s0, 128, %s23_s21, [#allocation3]  }
  0x24   :  { %s465_s16 = smov [#allocation7]   ;;  %s466_s18 = smov [#allocation8]  }
  0x25   :  { %s42_s17 = sshll.u32 %s465_s16, 4  ;;  %s52_s19 = sshll.u32 %s466_s18, 4  ;;  %s43_s17 = int_to_ptr.vmem [resolvable:$true] %s42_s17  ;;  %s53_s19 = int_to_ptr.vmem [resolvable:$true] %s52_s19 }
  0x26   :  { %s365_s23 = scalar_lea.hbm %s588_s2, 16 }
  0x27   :  { %p366_p2 = scmp.ne.s32.totalorder %s588_s2, %s365_s23  ;;  %p369_p3 = scmp.lt.u32.totalorder %s365_s23, %s588_s2 }
  0x29   :  { %p371_p4 = pnand %p369_p3, %p366_p2 }
  0x2b   :  { %374 = shalt.err (!%p371_p4)
}
  0x2c   :  { %s375_s0 = scalar_lea.vmem %s43_s17, 16  ;;  %s379_s21 = scalar_lea.vmem %s43_s17, 32 }
  0x2d   :  { %p376_p5 = scmp.ne.s32.totalorder %s43_s17, %s375_s0  ;;  %p380_p6 = scmp.lt.s32.totalorder %s43_s17, %s43_s17 }
  0x2e   :  { %p381_p7 = scmp.lt.s32.totalorder %s379_s21, %s375_s0 }
  0x30   :  { %p382_p8 = por %p381_p7, %p380_p6 }
  0x32   :  { %p383_p9 = pnand %p382_p8, %p376_p5 }
  0x34   :  { %386 = shalt.err (!%p383_p9)
}
  0x35   :  { %45 = dma.hbm_to_vmem [thread:$0]  %s588_s2, 16, %s43_s17, [#allocation6]  }
  0x36   :  { %s387_s7 = scalar_lea.hbm %s589_s3, 16 }
  0x37   :  { %p388_p10 = scmp.ne.s32.totalorder %s589_s3, %s387_s7  ;;  %p391_p11 = scmp.lt.u32.totalorder %s387_s7, %s589_s3 }
  0x39   :  { %p393_p12 = pnand %p391_p11, %p388_p10 }
  0x3b   :  { %396 = shalt.err (!%p393_p12)
}
  0x3c   :  { %s397_s12 = scalar_lea.vmem %s53_s19, 16  ;;  %s401_s13 = scalar_lea.vmem %s53_s19, 32 }
  0x3d   :  { %p398_p13 = scmp.ne.s32.totalorder %s53_s19, %s397_s12  ;;  %p402_p0 = scmp.lt.s32.totalorder %s53_s19, %s53_s19 }
  0x3e   :  { %p403_p1 = scmp.lt.s32.totalorder %s401_s13, %s397_s12 }
  0x40   :  { %p404_p2 = por %p403_p1, %p402_p0 }
  0x42   :  { %p405_p3 = pnand %p404_p2, %p398_p13 }
  0x44   :  { %408 = shalt.err (!%p405_p3)
}
  0x45   :  { %55 = dma.hbm_to_vmem [thread:$0]  %s589_s3, 16, %s53_s19, [#allocation9]  }
  0x46   :  { %453 = dma.done.wait [#allocation3], 128  }
  0x47   :  { %454 = vsyncadd [#allocation3], 4294967168 }
  0x48   :  { %455 = dma.done.wait [#allocation6], 144  }
  0x49   :  { %456 = vsyncadd [#allocation6], 4294967152 }
  0x4a   :  { %457 = dma.done.wait [#allocation9], 16  }
  0x4b   :  { %458 = vsyncadd [#allocation9], 4294967280  ;;  %v467_v0 = vmov 0.0   ;;  %vm468_vm0 = vmmov 0   ;;  %v469_v1 = vmov 0   ;;  %v70_v2 = vld [vmem:[#allocation2] sm:$0xff]  ;;  %v162_v13 = vlaneseq }
  0x4c   :  { %290 = vmatprep.subr.bf16.mxu0 %v467_v0  ;;  %292 = vmatprep.mubr.msk.bf16.mxu0 %vm468_vm0, %v467_v0  ;;  %vm74_vm1 = vcmask 261120   ;;  %v178_v3 = vld [vmem:[#allocation5] sm:$0xff]  ;;  %v78_v4 = vmul.f32 %v70_v2, %v70_v2  ;;  %v115_v5 = vpack.c.bf16 %v70_v2, %v70_v2  ;;  %v285_v24 = vld [vmem:[#allocation7] ss:$0 sm:$0xff]  ;;  %vm192_vm5 = vcmask 64512   ;;  %s470_s3 = smov [#allocation11]  }
  0x4d   :  { %305 = vset.pattern.permute.xlu1 %v469_v1  ;;  %306 = vset.pattern.permute.xlu0 %v469_v1  ;;  %v163_v14 = vshrl.u32 %v162_v13, 7  ;;  %s269_s1 = sshll.u32 %s470_s3, 4  ;;  %vm247_vm6 = vcmask 7168   ;;  %s270_s1 = int_to_ptr.vmem [resolvable:$true] %s269_s1 }
  0x4e   :  { %181 = vperm.xlu1 %305, %v178_v3   ;;  %v79_v6 = vsel %vm74_vm1, %v78_v4, 0.0  ;;  %v120_v7 = vsel %vm74_vm1, %v115_v5, 0  ;;  %s409_s15 = scalar_lea.vmem %s270_s1, 128  ;;  %p414_p5 = scmp.lt.s32.totalorder %s270_s1, %s270_s1 }
  0x4f   :  { %80 = vadd.xlane.f32.xlu0 %v79_v6  ;;  %291 = vmatpush3.bf16.xpose.msra.mxu0 %v120_v7  ;;  %v164_v16 = vsub.s32 0, %v163_v14  ;;  %p410_p4 = scmp.ne.s32.totalorder %s270_s1, %s409_s15  ;;  %p415_p6 = scmp.lt.s32.totalorder %s409_s15, %s409_s15 }
  0x51   :  { %p416_p7 = por %p415_p6, %p414_p5 }
  0x53   :  { %76 = vadd.xlane.f32.xlu0 %v79_v6  ;;  %p417_p8 = pnand %p416_p7, %p410_p4 }
  0x56   :  { %293 = vmatmul.mubr.msk.bf16.vlgmr.msra.gmra.mrb[0].mxu0 %vm74_vm1, %v115_v5 }
  0xcd   :  { %v182_v15 = vpop.permute.xlu1 %181 }
  0xce   :  { %vm187_vm2 = vcmp.eq.s32.totalorder %v182_v15, %v285_v24 }
  0xcf   :  { %v286_v26 = vsel %vm187_vm2, 1.0, %v467_v0 }
  0xd0   :  { %v190_v29 = vsub.f32 1.0, %v286_v26 }
  0xdc   :  { %v81_v8 = vpop.xlane.xlu0 %80 }
  0xdd   :  { %82 = vxpose.xlu1.b32.start.end [1/1] (short) (narrow) %v81_v8, 8 }
  0xe0   :  { %v77_v18 = vpop.xlane.xlu0 %76 }
 0x129   :  { %v156_v9 = vpop.f32.mrb[0].mxu0 }
 0x12a   :  { %v294_v10 = vpop.f32.mrb[1].mxu0  ;;  %v167_v19 = vmul.f32 2.0, %v156_v9 }
 0x12b   :  { %v159_v11 = vpop.f32.mrb[2].mxu0 }
 0x12c   :  { %v295_v12 = vpop.f32.mrb[3].mxu0 }
 0x15d   :  { %v98_v17 = vpop.trf.xlu1 }
 0x15e   :  { %v165_v20 = vrot.slane %v98_v17, %v164_v16 }
 0x160   :  { %v166_v21 = vadd.f32 %v165_v20, %v77_v18 }
 0x162   :  { %v168_v22 = vsub.f32 %v166_v21, %v167_v19 }
 0x164   :  { %v169_v23 = vmax.f32 %v168_v22, 1e-12 }
 0x166   :  { %307 = vrsqrt.f32 %v169_v23  ;;  %vm172_vm3 = vcmp.eq.f32.partialorder %v169_v23, inf  ;;  %v175_v28 = vand.u32 2147483648, %v169_v23  ;;  %vm174_vm4 = vcmp.eq.f32.partialorder %v169_v23, 0.0 }
 0x170   :  { %v308_v25 = vpop.eup %307 }
 0x171   :  { %v171_v27 = vmul.f32 %v308_v25, %v169_v23 }
 0x173   :  { %v173_v30 = vsel %vm172_vm3, %v169_v23, %v171_v27 }
 0x174   :  { %v176_v31 = vsel %vm174_vm4, %v175_v28, %v173_v30 }
 0x175   :  { %v191_v32 = vmul.f32 %v286_v26, %v176_v31  ;;  %v210_v33 = vmul.f32 %v190_v29, %v176_v31  ;;  %v215_v40 = vsub.f32 0.0, %v176_v31 }
 0x177   :  { %v193_v34 = vsel %vm192_vm5, %v191_v32, -inf  ;;  %v211_v35 = vsub.f32 0.0, %v210_v33 }
 0x178   :  { %194 = vmax.xlane.f32.xlu0 %v193_v34 }
 0x179   :  { %v212_v36 = vsel %vm192_vm5, %v211_v35, -inf }
 0x17c   :  { %213 = vmax.xlane.f32.xlu0 %v212_v36 }
 0x205   :  { %v195_v37 = vpop.xlane.xlu0 %194 }
 0x206   :  { %v196_v38 = vsub.f32 %v176_v31, %v195_v37 }
 0x208   :  { %v197_v39 = vmul.f32 1.442695, %v196_v38 }
 0x209   :  { %v214_v41 = vpop.xlane.xlu0 %213 }
 0x20a   :  { %309 = vpow2.f32 %v197_v39  ;;  %v216_v42 = vsub.f32 %v215_v40, %v214_v41 }
 0x20c   :  { %v217_v43 = vmul.f32 1.442695, %v216_v42 }
 0x20e   :  { %311 = vpow2.f32 %v217_v43 }
 0x214   :  { %v310_v44 = vpop.eup %309 }
 0x215   :  { %v199_v45 = vmul.f32 %v310_v44, %v286_v26 }
 0x217   :  { %v200_v46 = vsel %vm192_vm5, %v199_v45, 0.0  ;;  %v204_v50 = vmul.f32 %v199_v45, %v176_v31 }
 0x218   :  { %v312_v47 = vpop.eup %311  ;;  %201 = vadd.xlane.f32.xlu0 %v200_v46 }
 0x219   :  { %v219_v48 = vmul.f32 %v312_v47, %v190_v29  ;;  %v205_v51 = vsel %vm192_vm5, %v204_v50, 0.0 }
 0x21b   :  { %v220_v49 = vsel %vm192_vm5, %v219_v48, 0.0  ;;  %v224_v52 = vmul.f32 %v219_v48, %v176_v31 }
 0x21c   :  { %221 = vadd.xlane.f32.xlu0 %v220_v49 }
 0x21d   :  { %v225_v53 = vsel %vm192_vm5, %v224_v52, 0.0 }
 0x220   :  { %206 = vadd.xlane.f32.xlu0 %v205_v51 }
 0x224   :  { %226 = vadd.xlane.f32.xlu0 %v225_v53 }
 0x2a5   :  { %v202_v54 = vpop.xlane.xlu0 %201 }
 0x2a6   :  { %v203_v55 = vadd.f32 1e-06, %v202_v54 }
 0x2a8   :  { %313 = vrcp.f32 %v203_v55 }
 0x2a9   :  { %v222_v56 = vpop.xlane.xlu0 %221 }
 0x2aa   :  { %v223_v57 = vadd.f32 1e-06, %v222_v56 }
 0x2ac   :  { %315 = vrcp.f32 %v223_v57 }
 0x2ad   :  { %v207_v58 = vpop.xlane.xlu0 %206 }
 0x2b1   :  { %v227_v61 = vpop.xlane.xlu0 %226 }
 0x2b2   :  { %v314_v59 = vpop.eup %313 }
 0x2b3   :  { %v209_v62 = vmul.f32 %v314_v59, %v207_v58 }
 0x2b6   :  { %v316_v60 = vpop.eup %315 }
 0x2b7   :  { %v229_v63 = vmul.f32 %v316_v60, %v227_v61 }
 0x2b9   :  { %v230_v1 = vsub.f32 %v229_v63, %v209_v62  ;;  %vm249_vm7 = vcmp.ge.f32.partialorder %v229_v63, %v209_v62 }
 0x2ba   :  { %v287_v2 = vsel %vm249_vm7, 1.0, %v467_v0 }
 0x2bb   :  { %v233_v3 = vand.u32 2147483647, %v230_v1  ;;  %252 = vst.msk [vmem:[#allocation11] sm:$0xff] %vm247_vm6, %v287_v2 }
 0x2bc   :  { %420 = shalt.err (!%p417_p8)
}
 0x2bd   :  { %s421_s18 = scalar_lea.hbm %s591_s5, 128 }
 0x2be   :  { %p422_p9 = scmp.ne.s32.totalorder %s591_s5, %s421_s18  ;;  %p425_p10 = scmp.lt.u32.totalorder %s421_s18, %s591_s5 }
 0x2c0   :  { %p427_p11 = pnand %p425_p10, %p422_p9 }
 0x2c2   :  { %430 = shalt.err (!%p427_p11)
}
 0x2c3   :  { %272 = dma.vmem_to_hbm [thread:$0]  %s270_s1, 128, %s591_s5, [#allocation12]   ;;  %v234_v0 = vsub.f32 0.0, %v233_v3  ;;  %v231_v9 = vsub.f32 0.0, %v230_v1 }
 0x2c4   :  { %s471_s26 = smov [#allocation10]  }
 0x2c5   :  { %v235_v4 = vmul.f32 1.442695, %v234_v0  ;;  %s259_s27 = sshll.u32 %s471_s26, 4  ;;  %v232_v14 = vmax.f32 %v231_v9, 0.0  ;;  %s260_s27 = int_to_ptr.vmem [resolvable:$true] %s259_s27 }
 0x2c6   :  { %s431_s5 = scalar_lea.vmem %s260_s27, 128  ;;  %p436_p13 = scmp.lt.s32.totalorder %s260_s27, %s260_s27 }
 0x2c7   :  { %317 = vpow2.f32 %v235_v4  ;;  %p432_p12 = scmp.ne.s32.totalorder %s260_s27, %s431_s5  ;;  %p437_p0 = scmp.lt.s32.totalorder %s431_s5, %s431_s5 }
 0x2c9   :  { %p438_p1 = por %p437_p0, %p436_p13 }
 0x2cb   :  { %p439_p2 = pnand %p438_p1, %p432_p12 }
 0x2d1   :  { %v318_v5 = vpop.eup %317 }
 0x2d2   :  { %v237_v6 = vadd.f32 1.0, %v318_v5  ;;  %v240_v7 = vmul.f32 -0.5, %v318_v5  ;;  %v243_v10 = vand.u32 2147483647, %v318_v5 }
 0x2d4   :  { %319 = vlog2.f32 %v237_v6  ;;  %v241_v8 = vadd.f32 1.0, %v240_v7  ;;  %vm244_vm8 = vcmp.lt.f32.partialorder %v243_v10, 0.0004427343 }
 0x2d6   :  { %v242_v13 = vmul.f32 %v318_v5, %v241_v8 }
 0x2de   :  { %v320_v11 = vpop.eup %319 }
 0x2df   :  { %v239_v12 = vmul.f32 0.6931472, %v320_v11 }
 0x2e1   :  { %v245_v15 = vsel %vm244_vm8, %v242_v13, %v239_v12 }
 0x2e2   :  { %v246_v16 = vadd.f32 %v245_v15, %v232_v14 }
 0x2e4   :  { %248 = vst.msk [vmem:[#allocation10] sm:$0xff] %vm247_vm6, %v246_v16 }
 0x2e5   :  { %442 = shalt.err (!%p439_p2)
}
 0x2e6   :  { %s443_s28 = scalar_lea.hbm %s590_s4, 128 }
 0x2e7   :  { %p444_p3 = scmp.ne.s32.totalorder %s590_s4, %s443_s28  ;;  %p447_p4 = scmp.lt.u32.totalorder %s443_s28, %s590_s4 }
 0x2e9   :  { %p449_p5 = pnand %p447_p4, %p444_p3 }
 0x2eb   :  { %452 = shalt.err (!%p449_p5)
}
 0x2ec   :  { %262 = dma.vmem_to_hbm [thread:$0]  %s260_s27, 128, %s590_s4, [#allocation4]  }
 0x2ed   :  { %459 = dma.done.wait [#allocation4], 128  }
 0x2ee   :  { %460 = vsyncadd [#allocation4], 4294967168 }
 0x2ef   :  { %461 = dma.done.wait [#allocation12], 128  }
 0x2f0   :  { %462 = vsyncadd [#allocation12], 4294967168 }
 0x2f1   :  { %279 = vsyncpa [#allocation3], 1 }
 0x2f2   :  { %280 = vsyncpa [#allocation6], 1 }
 0x2f3   :  { %281 = vsyncpa [#allocation9], 1 }
 0x2f4   :  { %282 = vsyncpa [#allocation4], 1 }
 0x2f5   :  { %283 = vsyncpa [#allocation12], 1 }

</bundles_post_ra>
